<compile_context>
chip_gen: v7x
topology: tpu7x:2x2x1
jax: 0.10.0
libtpu: 0.0.40
codegen_flags: <defaults>
</compile_context>

<pallas_src>
import functools

import jax
import jax.numpy as jnp
from jax.experimental import pallas as pl
from jax.experimental.pallas import tpu as pltpu

LEAKY_SLOPE = 0.01   # nn.LeakyReLU() default
BN_EPS = 1e-5        # nn.BatchNorm2d default


# ---------------------------------------------------------------------------
# shared in-kernel helpers
# ---------------------------------------------------------------------------
def _build_cols(x_ref, col_ref, mask_l, mask_r, *, dilate, width, hw, cin, bt):
    """Assemble im2col (9*Cin, bt*HW) in VMEM from static lane-offset slices of the
    row-flattened, halo-padded input.  Vertical taps come from the H-halo rows,
    horizontal taps from the lane offset; the two edge masks zero taps that wrapped
    across a row.  The 3 kw taps of each kh are concatenated so only 3 wide
    (3*Cin)-row stores are issued per image instead of 9 narrow Cin-row stores."""
    d = dilate
    for b in range(bt):
        lane0 = b * hw
        for kh in range(3):
            base = kh * width * d
            taps = []
            for kw in range(3):
                off = base + kw * d                      # static Python int
                sl = x_ref[b, :, off:off + hw]           # (Cin, HW) bf16
                if kw == 0:
                    sl = sl * mask_l
                elif kw == 2:
                    sl = sl * mask_r
                taps.append(sl)
            col_ref[kh * 3 * cin:(kh + 1) * 3 * cin, lane0:lane0 + hw] = (
                jnp.concatenate(taps, axis=0))


def _conv_leaky(w_ref, b_ref, col_ref):
    # single MXU matmul, f32 accumulation, bias + LeakyReLU
    acc = jnp.dot(w_ref[...], col_ref[...], preferred_element_type=jnp.float32)
    acc = acc + b_ref[...]                               # (Cout, 1) broadcasts over lanes
    return jnp.where(acc > 0, acc, LEAKY_SLOPE * acc)


# ---------------------------------------------------------------------------
# Kernel 1: conv + bias + LeakyReLU -> per-step partial BN statistics only
#           (no activation written to HBM; batch axis is megacore-parallel)
# ---------------------------------------------------------------------------
def _stats_kernel(x_ref, w_ref, b_ref, mask_ref, sum_ref, sq_ref, col_ref,
                  *, dilate, height, width, bt):
    hw = height * width
    cin = x_ref.shape[1]
    _build_cols(x_ref, col_ref, mask_ref[0:1, :], mask_ref[1:2, :],
                dilate=dilate, width=width, hw=hw, cin=cin, bt=bt)
    y = _conv_leaky(w_ref, b_ref, col_ref)               # (Cout, bt*HW) f32
    sum_ref[...] = jnp.sum(y, axis=1, keepdims=True)     # per-step partial sums
    sq_ref[...] = jnp.sum(y * y, axis=1, keepdims=True)


# ---------------------------------------------------------------------------
# Kernel 2: recompute conv + LeakyReLU, apply precomputed BN scale/shift, store out
# ---------------------------------------------------------------------------
def _conv_bn_kernel(x_ref, w_ref, b_ref, mask_ref, scale_ref, shift_ref, o_ref, col_ref,
                    *, dilate, height, width, bt):
    hw = height * width
    cin = x_ref.shape[1]
    _build_cols(x_ref, col_ref, mask_ref[0:1, :], mask_ref[1:2, :],
                dilate=dilate, width=width, hw=hw, cin=cin, bt=bt)
    y = _conv_leaky(w_ref, b_ref, col_ref)               # (Cout, bt*HW) f32
    y = y * scale_ref[...] + shift_ref[...]
    for b in range(bt):                                  # lane-dense (HW multiple of 128) stores
        o_ref[b, :, :] = y[:, b * hw:(b + 1) * hw].astype(o_ref.dtype)


# ---------------------------------------------------------------------------
# wrapper
# ---------------------------------------------------------------------------
def _vmem_bytes(bt, cin, cout, hw, lp):
    x_blk = 2 * bt * cin * lp * 2          # double-buffered bf16 input block
    col = 9 * cin * bt * hw * 2            # im2col scratch (single buffer)
    y_live = cout * bt * hw * 4            # f32 conv result live in vregs / spill
    out_blk = 2 * bt * cout * hw * 4       # double-buffered f32 output block (pass 2)
    consts = 2 * (cout * 9 * cin * 2 + 2 * hw * 2 + 4 * cout * 4)
    return x_blk + col + y_live + out_blk + consts


def _pick_batch_tile(n, cin, cout, hw, lp, budget=48 * 1024 * 1024):
    # largest divisor of N up to 16 that fits the (v7x-safe) VMEM budget
    bt = 1
    for cand in range(1, min(n, 16) + 1):
        if n % cand == 0 and _vmem_bytes(cand, cin, cout, hw, lp) <= budget:
            bt = cand
    return bt


def atrous_conv_forward(x_nchw, w_oihw, bias, gamma, beta, dilate_rate):
    """AtrousConv forward: Conv2d(3x3, pad=d, dil=d) -> LeakyReLU -> BatchNorm2d (batch stats)."""
    N, Cin, H, W = x_nchw.shape
    Cout = w_oihw.shape[0]
    d = int(dilate_rate)
    HW = H * W
    Lp = (H + 2 * d) * W + 2 * d           # flattened length incl. vertical + horizontal halo

    # ---- layout-only prep (still NCHW, no transposes of x); bf16 halves x traffic ----
    xb = x_nchw.astype(jnp.bfloat16)
    x_pad = jnp.pad(xb, ((0, 0), (0, 0), (d, d), (0, 0)))                 # vertical halo rows
    x_flat = jnp.pad(x_pad.reshape(N, Cin, (H + 2 * d) * W),
                     ((0, 0), (0, 0), (d, d)))                            # (N, Cin, Lp)

    # weights OIHW -> (Cout, 9*Cin), row = (kh*3+kw)*Cin + ci (matches im2col assembly)
    w_flat = jnp.transpose(w_oihw, (0, 2, 3, 1)).reshape(Cout, 9 * Cin).astype(jnp.bfloat16)
    bias2 = bias.reshape(Cout, 1).astype(jnp.float32)

    # edge masks zeroing horizontally out-of-bounds taps (kw=0 left / kw=2 right)
    col_idx = jnp.arange(HW, dtype=jnp.int32) % W
    edge_mask = jnp.stack([(col_idx >= d), (col_idx < W - d)], axis=0).astype(jnp.bfloat16)

    bt = _pick_batch_tile(N, Cin, Cout, HW, Lp)
    nb = N // bt
    vmem_cap = int(min(100 * 1024 * 1024,
                       max(8 * 1024 * 1024, 2 * _vmem_bytes(bt, Cin, Cout, HW, Lp))))
    kernel_kwargs = dict(dilate=d, height=H, width=W, bt=bt)

    # ---- pass 1: per-step partial BN statistics (no activation written to HBM) ----
    sum_parts, sq_parts = pl.pallas_call(
        functools.partial(_stats_kernel, **kernel_kwargs),
        out_shape=(
            jax.ShapeDtypeStruct((nb, Cout, 1), jnp.float32),
            jax.ShapeDtypeStruct((nb, Cout, 1), jnp.float32),
        ),
        grid_spec=pltpu.PrefetchScalarGridSpec(
            num_scalar_prefetch=0,
            grid=(nb,),
            in_specs=[
                pl.BlockSpec((bt, Cin, Lp), lambda n: (n, 0, 0)),
                pl.BlockSpec((Cout, 9 * Cin), lambda n: (0, 0)),
                pl.BlockSpec((Cout, 1), lambda n: (0, 0)),
                pl.BlockSpec((2, HW), lambda n: (0, 0)),
            ],
            out_specs=(
                pl.BlockSpec((None, Cout, 1), lambda n: (n, 0, 0)),
                pl.BlockSpec((None, Cout, 1), lambda n: (n, 0, 0)),
            ),
            scratch_shapes=[pltpu.VMEM((9 * Cin, bt * HW), jnp.bfloat16)],
        ),
        compiler_params=pltpu.CompilerParams(
            dimension_semantics=("parallel",),     # per-step partials -> megacore-safe
            vmem_limit_bytes=vmem_cap),
    )(x_flat, w_flat, bias2, edge_mask)

    # ---- tiny wrapper reduction + per-channel scale/shift precompute ----
    inv_count = 1.0 / float(N * HW)
    mean = jnp.sum(sum_parts, axis=0) * inv_count                         # (Cout, 1)
    var = jnp.maximum(jnp.sum(sq_parts, axis=0) * inv_count - mean * mean, 0.0)
    inv_std = jax.lax.rsqrt(var + BN_EPS)
    scale = gamma.reshape(Cout, 1).astype(jnp.float32) * inv_std
    shift = beta.reshape(Cout, 1).astype(jnp.float32) - mean * scale

    # ---- pass 2: recompute conv + LeakyReLU (cheap) and apply normalization ----
    out_flat = pl.pallas_call(
        functools.partial(_conv_bn_kernel, **kernel_kwargs),
        out_shape=jax.ShapeDtypeStruct((N, Cout, HW), jnp.float32),
        grid_spec=pltpu.PrefetchScalarGridSpec(
            num_scalar_prefetch=0,
            grid=(nb,),
            in_specs=[
                pl.BlockSpec((bt, Cin, Lp), lambda n: (n, 0, 0)),
                pl.BlockSpec((Cout, 9 * Cin), lambda n: (0, 0)),
                pl.BlockSpec((Cout, 1), lambda n: (0, 0)),
                pl.BlockSpec((2, HW), lambda n: (0, 0)),
                pl.BlockSpec((Cout, 1), lambda n: (0, 0)),
                pl.BlockSpec((Cout, 1), lambda n: (0, 0)),
            ],
            out_specs=pl.BlockSpec((bt, Cout, HW), lambda n: (n, 0, 0)),
            scratch_shapes=[pltpu.VMEM((9 * Cin, bt * HW), jnp.bfloat16)],
        ),
        compiler_params=pltpu.CompilerParams(
            dimension_semantics=("parallel",),
            vmem_limit_bytes=vmem_cap),
    )(x_flat, w_flat, bias2, edge_mask, scale, shift)

    # contiguous reshape only (still NCHW, PyTorch layout)
    return out_flat.reshape(N, Cout, H, W)


# ---------------------------------------------------------------------------
# pure-JAX reference for validation
# ---------------------------------------------------------------------------
def _reference(x_nchw, w_oihw, bias, gamma, beta, d):
    y = jax.lax.conv_general_dilated(
        x_nchw, w_oihw, window_strides=(1, 1),
        padding=((d, d), (d, d)), rhs_dilation=(d, d),
        dimension_numbers=("NCHW", "OIHW", "NCHW"))
    y = y + bias.reshape(1, -1, 1, 1)
    y = jnp.where(y > 0, y, LEAKY_SLOPE * y)
    mean = jnp.mean(y, axis=(0, 2, 3), keepdims=True)
    var = jnp.mean((y - mean) ** 2, axis=(0, 2, 3), keepdims=True)
    return ((y - mean) * jax.lax.rsqrt(var + BN_EPS)
            * gamma.reshape(1, -1, 1, 1) + beta.reshape(1, -1, 1, 1))


if __name__ == "__main__":
    # shapes consistent with AtrousConv(input_dim=4, output_dim=8, dilate_rate=2)
    N, Cin, H, W = 2, 4, 16, 16
    Cout, dilate_rate = 8, 2

    key = jax.random.PRNGKey(0)
    kx, kw, kb, kg, kbe = jax.random.split(key, 5)
    x = jax.random.normal(kx, (N, Cin, H, W), jnp.float32)
    w = jax.random.normal(kw, (Cout, Cin, 3, 3), jnp.float32) * 0.1   # Conv2d weight (OIHW)
    b = jax.random.normal(kb, (Cout,), jnp.float32) * 0.1             # Conv2d bias
    gamma = 1.0 + 0.1 * jax.random.normal(kg, (Cout,), jnp.float32)   # BN weight
    beta = 0.1 * jax.random.normal(kbe, (Cout,), jnp.float32)         # BN bias

    out = atrous_conv_forward(x, w, b, gamma, beta, dilate_rate)
    out = jax.block_until_ready(out)

    ref = _reference(x, w, b, gamma, beta, dilate_rate)
    assert out.shape == (N, Cout, H, W)
    # bf16 MXU inputs (f32 accumulation) vs f32 reference -> bf16-appropriate tolerance
    assert jnp.allclose(out, ref, rtol=5e-2, atol=5e-2), "mismatch vs reference"

    print("KERNEL_OK")
</pallas_src>

<mosaic_0001>
module attributes {stable_mosaic.version = 11 : i64} {
  func.func @_stats_kernel(%arg0: i32, %arg1: memref<2x4x324xbf16, #tpu.memory_space<vmem>>, %arg2: memref<8x36xbf16, #tpu.memory_space<vmem>>, %arg3: memref<8x1xf32, #tpu.memory_space<vmem>>, %arg4: memref<2x256xbf16, #tpu.memory_space<vmem>>, %arg5: memref<1x8x1xf32, #tpu.memory_space<vmem>>, %arg6: memref<1x8x1xf32, #tpu.memory_space<vmem>>, %arg7: memref<36x512xbf16, #tpu.memory_space<vmem>>) attributes {dimension_semantics = [#tpu.dimension_semantics<parallel>], iteration_bounds = array<i64: 1>, scalar_prefetch = 0 : i64, scratch_operands = 1 : i64, tpu.core_type = #tpu.core_type<tc>, window_params = [{transform_indices = @transform_0, window_bounds = array<i64: 2, 4, 324>}, {pipeline_mode = #tpu.pipeline_mode<synchronous>, transform_indices = @transform_1, window_bounds = array<i64: 8, 36>}, {pipeline_mode = #tpu.pipeline_mode<synchronous>, transform_indices = @transform_2, window_bounds = array<i64: 8, 1>}, {pipeline_mode = #tpu.pipeline_mode<synchronous>, transform_indices = @transform_3, window_bounds = array<i64: 2, 256>}, {transform_indices = @transform_4, window_bounds = array<i64: 1, 8, 1>}, {transform_indices = @transform_5, window_bounds = array<i64: 1, 8, 1>}]} {
    %c0 = arith.constant 0 : index
    %c0_0 = arith.constant 0 : index
    %0 = vector.load %arg4[%c0, %c0_0] : memref<2x256xbf16, #tpu.memory_space<vmem>>, vector<1x256xbf16>
    %c1 = arith.constant 1 : index
    %c0_1 = arith.constant 0 : index
    %1 = vector.load %arg4[%c1, %c0_1] : memref<2x256xbf16, #tpu.memory_space<vmem>>, vector<1x256xbf16>
    %c0_2 = arith.constant 0 : index
    %c0_3 = arith.constant 0 : index
    %c0_4 = arith.constant 0 : index
    %2 = vector.load %arg1[%c0_2, %c0_3, %c0_4] : memref<2x4x324xbf16, #tpu.memory_space<vmem>>, vector<1x4x256xbf16>
    %3 = vector.shape_cast %2 : vector<1x4x256xbf16> to vector<4x256xbf16>
    %4 = vector.broadcast %0 : vector<1x256xbf16> to vector<4x256xbf16>
    %5 = arith.mulf %3, %4 : vector<4x256xbf16>
    %c0_5 = arith.constant 0 : index
    %c0_6 = arith.constant 0 : index
    %c2 = arith.constant 2 : index
    %6 = vector.load %arg1[%c0_5, %c0_6, %c2] : memref<2x4x324xbf16, #tpu.memory_space<vmem>>, vector<1x4x256xbf16>
    %7 = vector.shape_cast %6 : vector<1x4x256xbf16> to vector<4x256xbf16>
    %c0_7 = arith.constant 0 : index
    %c0_8 = arith.constant 0 : index
    %c4 = arith.constant 4 : index
    %8 = vector.load %arg1[%c0_7, %c0_8, %c4] : memref<2x4x324xbf16, #tpu.memory_space<vmem>>, vector<1x4x256xbf16>
    %9 = vector.shape_cast %8 : vector<1x4x256xbf16> to vector<4x256xbf16>
    %10 = vector.broadcast %1 : vector<1x256xbf16> to vector<4x256xbf16>
    %11 = arith.mulf %9, %10 : vector<4x256xbf16>
    %12 = tpu.concatenate %5, %7, %11 in 0 : vector<4x256xbf16>, vector<4x256xbf16>, vector<4x256xbf16> -> vector<12x256xbf16>
    %c0_9 = arith.constant 0 : index
    %c0_10 = arith.constant 0 : index
    %13 = vector.load %arg7[%c0_9, %c0_10] : memref<36x512xbf16, #tpu.memory_space<vmem>>, vector<12x256xbf16>
    tpu.vector_store %arg7[%c0_9, %c0_10], %12 {strides = array<i32>} : memref<36x512xbf16, #tpu.memory_space<vmem>>, vector<12x256xbf16>,
    %c0_11 = arith.constant 0 : index
    %c0_12 = arith.constant 0 : index
    %c32 = arith.constant 32 : index
    %14 = vector.load %arg1[%c0_11, %c0_12, %c32] : memref<2x4x324xbf16, #tpu.memory_space<vmem>>, vector<1x4x256xbf16>
    %15 = vector.shape_cast %14 : vector<1x4x256xbf16> to vector<4x256xbf16>
    %16 = vector.broadcast %0 : vector<1x256xbf16> to vector<4x256xbf16>
    %17 = arith.mulf %15, %16 : vector<4x256xbf16>
    %c0_13 = arith.constant 0 : index
    %c0_14 = arith.constant 0 : index
    %c34 = arith.constant 34 : index
    %18 = vector.load %arg1[%c0_13, %c0_14, %c34] : memref<2x4x324xbf16, #tpu.memory_space<vmem>>, vector<1x4x256xbf16>
    %19 = vector.shape_cast %18 : vector<1x4x256xbf16> to vector<4x256xbf16>
    %c0_15 = arith.constant 0 : index
    %c0_16 = arith.constant 0 : index
    %c36 = arith.constant 36 : index
    %20 = vector.load %arg1[%c0_15, %c0_16, %c36] : memref<2x4x324xbf16, #tpu.memory_space<vmem>>, vector<1x4x256xbf16>
    %21 = vector.shape_cast %20 : vector<1x4x256xbf16> to vector<4x256xbf16>
    %22 = vector.broadcast %1 : vector<1x256xbf16> to vector<4x256xbf16>
    %23 = arith.mulf %21, %22 : vector<4x256xbf16>
    %24 = tpu.concatenate %17, %19, %23 in 0 : vector<4x256xbf16>, vector<4x256xbf16>, vector<4x256xbf16> -> vector<12x256xbf16>
    %c12 = arith.constant 12 : index
    %c0_17 = arith.constant 0 : index
    %25 = vector.load %arg7[%c12, %c0_17] : memref<36x512xbf16, #tpu.memory_space<vmem>>, vector<12x256xbf16>
    tpu.vector_store %arg7[%c12, %c0_17], %24 {strides = array<i32>} : memref<36x512xbf16, #tpu.memory_space<vmem>>, vector<12x256xbf16>,
    %c0_18 = arith.constant 0 : index
    %c0_19 = arith.constant 0 : index
    %c64 = arith.constant 64 : index
    %26 = vector.load %arg1[%c0_18, %c0_19, %c64] : memref<2x4x324xbf16, #tpu.memory_space<vmem>>, vector<1x4x256xbf16>
    %27 = vector.shape_cast %26 : vector<1x4x256xbf16> to vector<4x256xbf16>
    %28 = vector.broadcast %0 : vector<1x256xbf16> to vector<4x256xbf16>
    %29 = arith.mulf %27, %28 : vector<4x256xbf16>
    %c0_20 = arith.constant 0 : index
    %c0_21 = arith.constant 0 : index
    %c66 = arith.constant 66 : index
    %30 = vector.load %arg1[%c0_20, %c0_21, %c66] : memref<2x4x324xbf16, #tpu.memory_space<vmem>>, vector<1x4x256xbf16>
    %31 = vector.shape_cast %30 : vector<1x4x256xbf16> to vector<4x256xbf16>
    %c0_22 = arith.constant 0 : index
    %c0_23 = arith.constant 0 : index
    %c68 = arith.constant 68 : index
    %32 = vector.load %arg1[%c0_22, %c0_23, %c68] : memref<2x4x324xbf16, #tpu.memory_space<vmem>>, vector<1x4x256xbf16>
    %33 = vector.shape_cast %32 : vector<1x4x256xbf16> to vector<4x256xbf16>
    %34 = vector.broadcast %1 : vector<1x256xbf16> to vector<4x256xbf16>
    %35 = arith.mulf %33, %34 : vector<4x256xbf16>
    %36 = tpu.concatenate %29, %31, %35 in 0 : vector<4x256xbf16>, vector<4x256xbf16>, vector<4x256xbf16> -> vector<12x256xbf16>
    %c24 = arith.constant 24 : index
    %c0_24 = arith.constant 0 : index
    %37 = vector.load %arg7[%c24, %c0_24] : memref<36x512xbf16, #tpu.memory_space<vmem>>, vector<12x256xbf16>
    tpu.vector_store %arg7[%c24, %c0_24], %36 {strides = array<i32>} : memref<36x512xbf16, #tpu.memory_space<vmem>>, vector<12x256xbf16>,
    %c1_25 = arith.constant 1 : index
    %c0_26 = arith.constant 0 : index
    %c0_27 = arith.constant 0 : index
    %38 = vector.load %arg1[%c1_25, %c0_26, %c0_27] : memref<2x4x324xbf16, #tpu.memory_space<vmem>>, vector<1x4x256xbf16>
    %39 = vector.shape_cast %38 : vector<1x4x256xbf16> to vector<4x256xbf16>
    %40 = vector.broadcast %0 : vector<1x256xbf16> to vector<4x256xbf16>
    %41 = arith.mulf %39, %40 : vector<4x256xbf16>
    %c1_28 = arith.constant 1 : index
    %c0_29 = arith.constant 0 : index
    %c2_30 = arith.constant 2 : index
    %42 = vector.load %arg1[%c1_28, %c0_29, %c2_30] : memref<2x4x324xbf16, #tpu.memory_space<vmem>>, vector<1x4x256xbf16>
    %43 = vector.shape_cast %42 : vector<1x4x256xbf16> to vector<4x256xbf16>
    %c1_31 = arith.constant 1 : index
    %c0_32 = arith.constant 0 : index
    %c4_33 = arith.constant 4 : index
    %44 = vector.load %arg1[%c1_31, %c0_32, %c4_33] : memref<2x4x324xbf16, #tpu.memory_space<vmem>>, vector<1x4x256xbf16>
    %45 = vector.shape_cast %44 : vector<1x4x256xbf16> to vector<4x256xbf16>
    %46 = vector.broadcast %1 : vector<1x256xbf16> to vector<4x256xbf16>
    %47 = arith.mulf %45, %46 : vector<4x256xbf16>
    %48 = tpu.concatenate %41, %43, %47 in 0 : vector<4x256xbf16>, vector<4x256xbf16>, vector<4x256xbf16> -> vector<12x256xbf16>
    %c0_34 = arith.constant 0 : index
    %c256 = arith.constant 256 : index
    %49 = vector.load %arg7[%c0_34, %c256] : memref<36x512xbf16, #tpu.memory_space<vmem>>, vector<12x256xbf16>
    tpu.vector_store %arg7[%c0_34, %c256], %48 {strides = array<i32>} : memref<36x512xbf16, #tpu.memory_space<vmem>>, vector<12x256xbf16>,
    %c1_35 = arith.constant 1 : index
    %c0_36 = arith.constant 0 : index
    %c32_37 = arith.constant 32 : index
    %50 = vector.load %arg1[%c1_35, %c0_36, %c32_37] : memref<2x4x324xbf16, #tpu.memory_space<vmem>>, vector<1x4x256xbf16>
    %51 = vector.shape_cast %50 : vector<1x4x256xbf16> to vector<4x256xbf16>
    %52 = vector.broadcast %0 : vector<1x256xbf16> to vector<4x256xbf16>
    %53 = arith.mulf %51, %52 : vector<4x256xbf16>
    %c1_38 = arith.constant 1 : index
    %c0_39 = arith.constant 0 : index
    %c34_40 = arith.constant 34 : index
    %54 = vector.load %arg1[%c1_38, %c0_39, %c34_40] : memref<2x4x324xbf16, #tpu.memory_space<vmem>>, vector<1x4x256xbf16>
    %55 = vector.shape_cast %54 : vector<1x4x256xbf16> to vector<4x256xbf16>
    %c1_41 = arith.constant 1 : index
    %c0_42 = arith.constant 0 : index
    %c36_43 = arith.constant 36 : index
    %56 = vector.load %arg1[%c1_41, %c0_42, %c36_43] : memref<2x4x324xbf16, #tpu.memory_space<vmem>>, vector<1x4x256xbf16>
    %57 = vector.shape_cast %56 : vector<1x4x256xbf16> to vector<4x256xbf16>
    %58 = vector.broadcast %1 : vector<1x256xbf16> to vector<4x256xbf16>
    %59 = arith.mulf %57, %58 : vector<4x256xbf16>
    %60 = tpu.concatenate %53, %55, %59 in 0 : vector<4x256xbf16>, vector<4x256xbf16>, vector<4x256xbf16> -> vector<12x256xbf16>
    %c12_44 = arith.constant 12 : index
    %c256_45 = arith.constant 256 : index
    %61 = vector.load %arg7[%c12_44, %c256_45] : memref<36x512xbf16, #tpu.memory_space<vmem>>, vector<12x256xbf16>
    tpu.vector_store %arg7[%c12_44, %c256_45], %60 {strides = array<i32>} : memref<36x512xbf16, #tpu.memory_space<vmem>>, vector<12x256xbf16>,
    %c1_46 = arith.constant 1 : index
    %c0_47 = arith.constant 0 : index
    %c64_48 = arith.constant 64 : index
    %62 = vector.load %arg1[%c1_46, %c0_47, %c64_48] : memref<2x4x324xbf16, #tpu.memory_space<vmem>>, vector<1x4x256xbf16>
    %63 = vector.shape_cast %62 : vector<1x4x256xbf16> to vector<4x256xbf16>
    %64 = vector.broadcast %0 : vector<1x256xbf16> to vector<4x256xbf16>
    %65 = arith.mulf %63, %64 : vector<4x256xbf16>
    %c1_49 = arith.constant 1 : index
    %c0_50 = arith.constant 0 : index
    %c66_51 = arith.constant 66 : index
    %66 = vector.load %arg1[%c1_49, %c0_50, %c66_51] : memref<2x4x324xbf16, #tpu.memory_space<vmem>>, vector<1x4x256xbf16>
    %67 = vector.shape_cast %66 : vector<1x4x256xbf16> to vector<4x256xbf16>
    %c1_52 = arith.constant 1 : index
    %c0_53 = arith.constant 0 : index
    %c68_54 = arith.constant 68 : index
    %68 = vector.load %arg1[%c1_52, %c0_53, %c68_54] : memref<2x4x324xbf16, #tpu.memory_space<vmem>>, vector<1x4x256xbf16>
    %69 = vector.shape_cast %68 : vector<1x4x256xbf16> to vector<4x256xbf16>
    %70 = vector.broadcast %1 : vector<1x256xbf16> to vector<4x256xbf16>
    %71 = arith.mulf %69, %70 : vector<4x256xbf16>
    %72 = tpu.concatenate %65, %67, %71 in 0 : vector<4x256xbf16>, vector<4x256xbf16>, vector<4x256xbf16> -> vector<12x256xbf16>
    %c24_55 = arith.constant 24 : index
    %c256_56 = arith.constant 256 : index
    %73 = vector.load %arg7[%c24_55, %c256_56] : memref<36x512xbf16, #tpu.memory_space<vmem>>, vector<12x256xbf16>
    tpu.vector_store %arg7[%c24_55, %c256_56], %72 {strides = array<i32>} : memref<36x512xbf16, #tpu.memory_space<vmem>>, vector<12x256xbf16>,
    %c0_57 = arith.constant 0 : index
    %c0_58 = arith.constant 0 : index
    %74 = vector.load %arg2[%c0_57, %c0_58] : memref<8x36xbf16, #tpu.memory_space<vmem>>, vector<8x36xbf16>
    %c0_59 = arith.constant 0 : index
    %c0_60 = arith.constant 0 : index
    %75 = vector.load %arg7[%c0_59, %c0_60] : memref<36x512xbf16, #tpu.memory_space<vmem>>, vector<36x512xbf16>
    %cst = arith.constant dense<0.000000e+00> : vector<8x512xf32>
    %76 = tpu.matmul %74, %75, %cst {dimension_numbers = #tpu.dot_dimension_numbers<[1], [0], [0], [1], [0, 0, 1, 1], [], []>} : vector<8x36xbf16>, vector<36x512xbf16>, vector<8x512xf32> -> vector<8x512xf32>
    %c0_61 = arith.constant 0 : index
    %c0_62 = arith.constant 0 : index
    %77 = vector.load %arg3[%c0_61, %c0_62] : memref<8x1xf32, #tpu.memory_space<vmem>>, vector<8x1xf32>
    %78 = vector.broadcast %77 : vector<8x1xf32> to vector<8x512xf32>
    %79 = arith.addf %76, %78 : vector<8x512xf32>
    %cst_63 = arith.constant 0.000000e+00 : f32
    %80 = vector.broadcast %cst_63 : f32 to vector<8x512xf32>
    %81 = arith.cmpf ogt, %79, %80 : vector<8x512xf32>
    %cst_64 = arith.constant 0.00999999977 : f32
    %82 = vector.broadcast %cst_64 : f32 to vector<8x512xf32>
    %83 = arith.mulf %82, %79 : vector<8x512xf32>
    %84 = arith.select %81, %79, %83 : vector<8x512xi1>, vector<8x512xf32>
    %cst_65 = arith.constant dense<0.000000e+00> : vector<8xf32>
    %85 = vector.multi_reduction <add>, %84, %cst_65 [1] : vector<8x512xf32> to vector<8xf32>
    %86 = vector.shape_cast %85 : vector<8xf32> to vector<8x1xf32>
    %c0_66 = arith.constant 0 : index
    %c0_67 = arith.constant 0 : index
    %c0_68 = arith.constant 0 : index
    %87 = vector.load %arg5[%c0_66, %c0_67, %c0_68] : memref<1x8x1xf32, #tpu.memory_space<vmem>>, vector<1x8x1xf32>
    %88 = vector.shape_cast %87 : vector<1x8x1xf32> to vector<8x1xf32>
    %89 = vector.shape_cast %86 : vector<8x1xf32> to vector<1x8x1xf32>
    tpu.vector_store %arg5[%c0_66, %c0_67, %c0_68], %89 {strides = array<i32>} : memref<1x8x1xf32, #tpu.memory_space<vmem>>, vector<1x8x1xf32>,
    %90 = arith.mulf %84, %84 : vector<8x512xf32>
    %cst_69 = arith.constant dense<0.000000e+00> : vector<8xf32>
    %91 = vector.multi_reduction <add>, %90, %cst_69 [1] : vector<8x512xf32> to vector<8xf32>
    %92 = vector.shape_cast %91 : vector<8xf32> to vector<8x1xf32>
    %c0_70 = arith.constant 0 : index
    %c0_71 = arith.constant 0 : index
    %c0_72 = arith.constant 0 : index
    %93 = vector.load %arg6[%c0_70, %c0_71, %c0_72] : memref<1x8x1xf32, #tpu.memory_space<vmem>>, vector<1x8x1xf32>
    %94 = vector.shape_cast %93 : vector<1x8x1xf32> to vector<8x1xf32>
    %95 = vector.shape_cast %92 : vector<8x1xf32> to vector<1x8x1xf32>
    tpu.vector_store %arg6[%c0_70, %c0_71, %c0_72], %95 {strides = array<i32>} : memref<1x8x1xf32, #tpu.memory_space<vmem>>, vector<1x8x1xf32>,
    return
  }
  func.func @transform_0(%arg0: i32) -> (i32, i32, i32) {
    %c0_i32 = arith.constant 0 : i32
    %c0_i32_0 = arith.constant 0 : i32
    %c0_i32_1 = arith.constant 0 : i32
    return %arg0, %c0_i32, %c0_i32_0 : i32, i32, i32
  }
  func.func @transform_1(%arg0: i32) -> (i32, i32) {
    %c0_i32 = arith.constant 0 : i32
    %c0_i32_0 = arith.constant 0 : i32
    %c0_i32_1 = arith.constant 0 : i32
    return %c0_i32, %c0_i32_0 : i32, i32
  }
  func.func @transform_2(%arg0: i32) -> (i32, i32) {
    %c0_i32 = arith.constant 0 : i32
    %c0_i32_0 = arith.constant 0 : i32
    %c0_i32_1 = arith.constant 0 : i32
    return %c0_i32, %c0_i32_0 : i32, i32
  }
  func.func @transform_3(%arg0: i32) -> (i32, i32) {
    %c0_i32 = arith.constant 0 : i32
    %c0_i32_0 = arith.constant 0 : i32
    %c0_i32_1 = arith.constant 0 : i32
    return %c0_i32, %c0_i32_0 : i32, i32
  }
  func.func @transform_4(%arg0: i32) -> (i32, i32, i32) {
    %c0_i32 = arith.constant 0 : i32
    %c0_i32_0 = arith.constant 0 : i32
    %c0_i32_1 = arith.constant 0 : i32
    return %arg0, %c0_i32, %c0_i32_0 : i32, i32, i32
  }
  func.func @transform_5(%arg0: i32) -> (i32, i32, i32) {
    %c0_i32 = arith.constant 0 : i32
    %c0_i32_0 = arith.constant 0 : i32
    %c0_i32_1 = arith.constant 0 : i32
    return %arg0, %c0_i32, %c0_i32_0 : i32, i32, i32
  }
}

</mosaic_0001>

<bundles_post_ra>
// kernel: tpu_custom_call.1
= control target key start
LH: loop header
LB: loop body
LE: loop exit
PB: predicated region body
PF: predicated region fallthrough
CT: control target
= control target key end

     0   :  { %11 = vsyncpa [#allocation4], 0  ;;  %s1102_s18 = smov [#allocation3]   ;;  %s1479_s0 = inlined_call_operand.hbm [shape: bf16[2,4,324], index: 0, kind: input, shape index: {}]   ;;  %s1480_s1 = inlined_call_operand.vmem [shape: bf16[8,36], index: 1, kind: input, shape index: {}]   ;;  %s1481_s2 = inlined_call_operand.vmem [shape: f32[8,1], index: 2, kind: input, shape index: {}]   ;;  %s1482_s3 = inlined_call_operand.vmem [shape: bf16[2,256], index: 3, kind: input, shape index: {}]   ;;  %s1483_s4 = inlined_call_operand.vmem [shape: f32[1,8,1], index: 4, kind: output, shape index: {0}]   ;;  %s1484_s5 = inlined_call_operand.vmem [shape: f32[1,8,1], index: 5, kind: output, shape index: {1}]  }
   0x1   :  { %s17_s19 = sshll.u32 %s1102_s18, 4  ;;  %s1078_s22 = scalar_lea.hbm %s1479_s0, 192  ;;  %s18_s19 = int_to_ptr.vmem [resolvable:$true] %s17_s19 }
   0x2   :  { %p1079_p0 = scmp.ne.s32.totalorder %s1479_s0, %s1078_s22  ;;  %p1082_p1 = scmp.lt.u32.totalorder %s1078_s22, %s1479_s0 }
   0x4   :  { %p1084_p2 = pnand %p1082_p1, %p1079_p0 }
   0x6   :  { %1087 = shalt.err (!%p1084_p2)
}
   0x7   :  { %s1088_s27 = scalar_lea.vmem %s18_s19, 192  ;;  %p1093_p4 = scmp.lt.s32.totalorder %s18_s19, %s18_s19 }
   0x8   :  { %p1089_p3 = scmp.ne.s32.totalorder %s18_s19, %s1088_s27  ;;  %p1094_p5 = scmp.lt.s32.totalorder %s1088_s27, %s1088_s27 }
   0xa   :  { %p1095_p6 = por %p1094_p5, %p1093_p4 }
   0xc   :  { %p1096_p7 = pnand %p1095_p6, %p1089_p3 }
   0xe   :  { %1099 = shalt.err (!%p1096_p7)
}
   0xf   :  { %s1103_s28 = smov 96   ;;  %s1104_s29 = smov 6  }
  0x10   :  { %23 = dma.hbm_to_vmem [thread:$0]  %s1479_s0, 192, %s18_s19, [#allocation4], %s1103_s28, %s1103_s28, %s1104_s29  }
  0x11   :  { %1100 = dma.done.wait [#allocation4], 192  }
  0x12   :  { %1101 = vsyncadd [#allocation4], 4294967104  ;;  %v48_v0 = vlaneseq  ;;  %v1105_v1 = vmov 1966171168   ;;  %v1106_v7 = vmov 1983009808  }
  0x13   :  { %v46_v2 = vunpack.c.l.s4 %v1105_v1  ;;  %v1014_v6 = vld.sshfl [vmem:[%s1482_s3] sm:$0x11 pattern:$0x75316420]  ;;  %v77_v8 = vunpack.c.l.s4 %v1106_v7  ;;  %v1162_v20 = vld [vmem:[#allocation3] sm:$0x3f] }
  0x14   :  { %v49_v3 = vshrl.u32 %v48_v0, 7  ;;  %v44_v9 = vcombine.high %v1014_v6, %v1014_v6  ;;  %v236_v27 = vcombine.low %v1162_v20, %v1162_v20  ;;  %s1107_s0 = smov 32   ;;  %v565_v32 = vld [vmem:[#allocation3 + $0x6] sm:$0x3f]  ;;  %s1108_s3 = smov 36   ;;  %vm207_vm0 = vcmask 261120  }
  0x15   :  { %v47_v4 = vunpack.c.0.s8 %v46_v2  ;;  %v78_v15 = vunpack.c.0.s8 %v77_v8  ;;  %s1109_s9 = smov 126   ;;  %v586_v34 = vcombine.low %v565_v32, %v565_v32  ;;  %s1110_s10 = smov 68   ;;  %v1179_v36 = vld [vmem:[#allocation3] sm:$0x3f]  ;;  %v1183_v38 = vld [vmem:[#allocation3 + $0x6] sm:$0x3f] }
  0x16   :  { %v64_v12 = vsub.s32 0, %v49_v3  ;;  %s1111_s11 = smov 64   ;;  %v380_v40 = vcombine.low %v1179_v36, %v1179_v36  ;;  %v713_v42 = vcombine.low %v1183_v38, %v1183_v38  ;;  %s1112_s12 = smov 4   ;;  %vm214_vm1 = vcmask 293888  }
  0x17   :  { %v50_v5 = vsub.s32 %v47_v4, %v49_v3  ;;  %v1164_v24 = vsub.s32 %v78_v15, %v49_v3  ;;  %vm358_vm2 = vcmask 556032   ;;  %s1113_s13 = smov 124   ;;  %vm179_vm3 = vcmask 1041408  }
  0x18   :  { %vm149_vm4 = vcmask 1031168   ;;  %vm113_vm5 = vcmask 31744   ;;  %vm351_vm6 = vcmask 523264   ;;  %vm176_vm7 = vcmask 1014784  }
  0x19   :  { %v51_v10 = vrot.slane %v1014_v6, %v50_v5  ;;  %v58_v11 = vrot.slane %v44_v9, %v50_v5  ;;  %v243_v31 = vrot.slane %v236_v27, %v1164_v24  ;;  %v250_v33 = vrot.slane %v1162_v20, %v1164_v24 }
  0x1a   :  { %v593_v35 = vrot.slane %v586_v34, %v1164_v24  ;;  %v600_v39 = vrot.slane %v565_v32, %v1164_v24  ;;  %v387_v43 = vrot.slane %v380_v40, %v1164_v24  ;;  %v720_v45 = vrot.slane %v713_v42, %v1164_v24 }
  0x1b   :  { %v86_v13 = vshrl.u32 %v51_v10, 16  ;;  %v60_v14 = vpack.i.b16 %v51_v10, %v51_v10  ;;  %v93_v17 = vshrl.u32 %v58_v11, 16  ;;  %v67_v19 = vpack.i.b16 %v58_v11, %v58_v11 }
  0x1c   :  { %v251_v37 = vcombine.high %v243_v31, %v243_v31  ;;  %v601_v41 = vcombine.high %v593_v35, %v593_v35  ;;  %v395_v44 = vcombine.high %v387_v43, %v387_v43  ;;  %v728_v46 = vcombine.high %v720_v45, %v720_v45 }
  0x1d   :  { %v87_v16 = vpack.i.b16 %v86_v13, %v86_v13  ;;  %v65_v18 = vrot.slane %v60_v14, %v64_v12  ;;  %v94_v22 = vpack.i.b16 %v93_v17, %v93_v17  ;;  %v72_v23 = vrot.slane %v67_v19, %v64_v12 }
  0x1e   :  { %v394_v47 = vrot.slane %v1179_v36, %v1164_v24  ;;  %v727_v48 = vrot.slane %v1183_v38, %v1164_v24  ;;  %vm186_vm8 = vcmask 1043456   ;;  %vm315_vm9 = vcmask 1045508  }
  0x1f   :  { %v92_v21 = vrot.slane %v87_v16, %v64_v12  ;;  %v99_v25 = vrot.slane %v94_v22, %v64_v12  ;;  %v75_v26 = vcombine.low %v65_v18, %v72_v23  ;;  %v85_v23 = vld [vmem:[#allocation3] sm:$0x3f]  ;;  %vm1325_vm10 = vmor %vm179_vm3, %vm315_vm9  ;;  %vm339_vm11 = vcmask 785408  }
  0x20   :  { %v127_v34 = vcombine.low %v85_v23, %v85_v23 }
  0x21   :  { %v102_v28 = vcombine.low %v92_v21, %v99_v25  ;;  %v1169_v29 = vrot.slane %v75_v26, %v1164_v24 }
  0x23   :  { %v109_v30 = vrot.slane %v102_v28, %v1164_v24  ;;  %204 = vrot.lane.b32.xlu1 %v1169_v29, %s1107_s0 }
  0x25   :  { %211 = vrot.lane.b32.xlu0 %v109_v30, %s1108_s3 }
  0x27   :  { %252 = vrot.lane.b32.xlu1 %v243_v31, %s1109_s9 }
  0x29   :  { %355 = vrot.lane.b32.xlu0 %v109_v30, %s1110_s10 }
  0x2b   :  { %256 = vrot.lane.b32.xlu1 %v250_v33, %s1109_s9 }
  0x2d   :  { %348 = vrot.lane.b32.xlu0 %v1169_v29, %s1111_s11 }
  0x2f   :  { %602 = vrot.lane.b32.xlu1 %v593_v35, %s1109_s9 }
  0x31   :  { %254 = vrot.lane.b32.xlu0 %v251_v37, %s1109_s9 }
  0x33   :  { %606 = vrot.lane.b32.xlu1 %v600_v39, %s1109_s9 }
  0x35   :  { %604 = vrot.lane.b32.xlu0 %v601_v41, %s1109_s9 }
  0x37   :  { %110 = vrot.lane.b32.xlu1 %v109_v30, %s1112_s12 }
  0x39   :  { %398 = vrot.lane.b32.xlu0 %v395_v44, %s1109_s9  ;;  %v134_v44 = vrot.slane %v127_v34, %v1164_v24 }
  0x3b   :  { %396 = vrot.lane.b32.xlu1 %v387_v43, %s1109_s9 }
  0x3d   :  { %731 = vrot.lane.b32.xlu0 %v728_v46, %s1109_s9 }
  0x3f   :  { %400 = vrot.lane.b32.xlu1 %v394_v47, %s1109_s9 }
  0x43   :  { %729 = vrot.lane.b32.xlu1 %v720_v45, %s1109_s9 }
  0x47   :  { %733 = vrot.lane.b32.xlu1 %v727_v48, %s1109_s9 }
  0x95   :  { %v205_v49 = vpop.permute.xlu1 %204 }
  0x96   :  { %v206_v50 = vrot.slane %v205_v49, 6 }
  0x97   :  { %v212_v51 = vpop.permute.xlu0 %211 }
  0x98   :  { %v213_v52 = vrot.slane %v212_v51, 6  ;;  %v208_v53 = vsel %vm207_vm0, %v206_v50, %v205_v49  ;;  %v141_v49 = vrot.slane %v85_v23, %v1164_v24  ;;  %vm993_vm0 = vcmask 7168  }
  0x99   :  { %v210_v54 = vmul.bf16 %v208_v53, %v1162_v20  ;;  %v253_v55 = vpop.permute.xlu1 %252  ;;  %v566_v57 = vmul.bf16 %v565_v32, %v208_v53 }
  0x9a   :  { %v215_v56 = vsel %vm214_vm1, %v213_v52, %v212_v51  ;;  %v481_v51 = vld [vmem:[#allocation3 + $0x6] sm:$0x3f] }
  0x9b   :  { %v217_v58 = vmul.bf16 %v215_v56, %v1162_v20  ;;  %v1209_v59 = vmul.bf16 %v565_v32, %v215_v56  ;;  %v356_v60 = vpop.permute.xlu0 %355  ;;  %v219_v61 = vcombine.high %v210_v54, %v210_v54  ;;  %v226_v2 = vrot.slane %v210_v54, %v1164_v24 }
  0x9c   :  { %v357_v62 = vrot.slane %v356_v60, 6  ;;  %v569_v3 = vcombine.high %v566_v57, %v566_v57  ;;  %v576_v10 = vrot.slane %v566_v57, %v1164_v24 }
  0x9d   :  { %v268_v63 = vrot.slane %v217_v58, %v1164_v24  ;;  %v257_v0 = vpop.permute.xlu1 %256  ;;  %v233_v4 = vrot.slane %v219_v61, %v1164_v24  ;;  %v618_v7 = vrot.slane %v1209_v59, %v1164_v24  ;;  %v234_v12 = vcombine.high %v226_v2, %v226_v2 }
  0x9e   :  { %v359_v1 = vsel %vm358_vm2, %v357_v62, %v356_v60  ;;  %v583_v13 = vrot.slane %v569_v3, %v1164_v24  ;;  %v584_v20 = vcombine.high %v576_v10, %v576_v10  ;;  %v261_v27 = vcombine.high %v217_v58, %v217_v58 }
  0x9f   :  { %v361_v5 = vmul.bf16 %v359_v1, %v1179_v36  ;;  %280 = vrot.lane.b32.xlu1 %v268_v63, %s1113_s13  ;;  %v276_v6 = vcombine.low %v268_v63, %v268_v63  ;;  %v1218_v8 = vpop.permute.xlu0 %348  ;;  %v1221_v9 = vsel %vm179_vm3, %v233_v4, %v257_v0  ;;  %v694_v14 = vmul.bf16 %v1183_v38, %v359_v1 }
  0xa0   :  { %v626_v15 = vcombine.low %v618_v7, %v618_v7  ;;  %v611_v41 = vcombine.high %v1209_v59, %v1209_v59  ;;  %v275_v43 = vrot.slane %v261_v27, %v1164_v24  ;;  %v507_v61 = vrot.slane %v481_v51, %v1164_v24 }
  0xa1   :  { %278 = vrot.lane.b32.xlu0 %v276_v6, %s1113_s13  ;;  %v603_v11 = vpop.permute.xlu1 %602  ;;  %v412_v16 = vrot.slane %v361_v5, %v1164_v24  ;;  %v745_v30 = vrot.slane %v694_v14, %v1164_v24  ;;  %v405_v46 = vcombine.high %v361_v5, %v361_v5  ;;  %v738_v52 = vcombine.high %v694_v14, %v694_v14 }
  0xa2   :  { %v277_v47 = vcombine.low %v275_v43, %v275_v43  ;;  %v625_v48 = vrot.slane %v611_v41, %v1164_v24  ;;  %v142_v63 = vcombine.high %v134_v44, %v134_v44 }
  0xa3   :  { %630 = vrot.lane.b32.xlu1 %v618_v7, %s1113_s13  ;;  %v255_v17 = vpop.permute.xlu0 %254  ;;  %v420_v28 = vcombine.low %v412_v16, %v412_v16  ;;  %v753_v42 = vcombine.low %v745_v30, %v745_v30  ;;  %v419_v54 = vrot.slane %v405_v46, %v1164_v24  ;;  %v752_v58 = vrot.slane %v738_v52, %v1164_v24 }
  0xa4   :  { %v258_v18 = vsel %vm149_vm4, %v253_v55, %v255_v17  ;;  %v259_v19 = vsel %vm149_vm4, %v255_v17, %v257_v0  ;;  %v627_v53 = vcombine.low %v625_v48, %v625_v48  ;;  %v493_v55 = vcombine.low %v481_v51, %v481_v51 }
  0xa5   :  { %628 = vrot.lane.b32.xlu0 %v626_v15, %s1113_s13  ;;  %v607_v21 = vpop.permute.xlu1 %606  ;;  %v1236_v25 = vsel %vm179_vm3, %v226_v2, %v258_v18  ;;  %v1239_v26 = vsel %vm179_vm3, %v234_v12, %v259_v19  ;;  %v421_v57 = vcombine.low %v419_v54, %v419_v54  ;;  %v754_v60 = vcombine.low %v752_v58, %v752_v58 }
  0xa6   :  { %v1233_v22 = vsel %vm179_vm3, %v583_v13, %v607_v21  ;;  %v500_v59 = vrot.slane %v493_v55, %v1164_v24 }
  0xa7   :  { %424 = vrot.lane.b32.xlu1 %v412_v16, %s1113_s13  ;;  %v605_v31 = vpop.permute.xlu0 %604 }
  0xa8   :  { %v608_v32 = vsel %vm149_vm4, %v603_v11, %v605_v31  ;;  %v609_v33 = vsel %vm149_vm4, %v605_v31, %v607_v21  ;;  %v508_v3 = vcombine.high %v500_v59, %v500_v59 }
  0xa9   :  { %422 = vrot.lane.b32.xlu0 %v420_v28, %s1113_s13  ;;  %v111_v35 = vpop.permute.xlu1 %110  ;;  %v1247_v37 = vsel %vm179_vm3, %v576_v10, %v608_v32  ;;  %v1250_v39 = vsel %vm179_vm3, %v584_v20, %v609_v33 }
  0xaa   :  { %v112_v40 = vrot.slane %v111_v35, 6 }
  0xab   :  { %757 = vrot.lane.b32.xlu1 %v745_v30, %s1113_s13  ;;  %v399_v15 = vpop.permute.xlu0 %398 }
  0xac   :  { %v114_v45 = vsel %vm113_vm5, %v112_v40, %v111_v35 }
  0xad   :  { %755 = vrot.lane.b32.xlu0 %v753_v42, %s1113_s13  ;;  %v116_v50 = vmul.bf16 %v114_v45, %v85_v23  ;;  %v482_v62 = vmul.bf16 %v481_v51, %v114_v45  ;;  %v397_v12 = vpop.permute.xlu1 %396  ;;  %v350_v23 = vrot.slane %v1218_v8, 6 }
  0xae   :  { %v402_v46 = vsel %vm149_vm4, %v397_v12, %v399_v15 }
  0xaf   :  { %143 = vrot.lane.b32.xlu1 %v134_v44, %s1109_s9  ;;  %v160_v56 = vrot.slane %v116_v50, %v1164_v24  ;;  %v525_v0 = vrot.slane %v482_v62, %v1164_v24  ;;  %v153_v2 = vcombine.high %v116_v50, %v116_v50  ;;  %v518_v4 = vcombine.high %v482_v62, %v482_v62  ;;  %v732_v17 = vpop.permute.xlu0 %731 }
  0xb0   :  { %v352_v30 = vsel %vm351_vm6, %v350_v23, %v1218_v8 }
  0xb1   :  { %282 = vrot.lane.b32.xlu0 %v277_v47, %s1113_s13  ;;  %v168_v1 = vcombine.low %v160_v56, %v160_v56  ;;  %v533_v5 = vcombine.low %v525_v0, %v525_v0  ;;  %v167_v6 = vrot.slane %v153_v2, %v1164_v24  ;;  %v532_v10 = vrot.slane %v518_v4, %v1164_v24  ;;  %v401_v13 = vpop.permute.xlu1 %400 }
  0xb2   :  { %v354_v31 = vmul.bf16 %v352_v30, %v1179_v36  ;;  %v693_v32 = vmul.bf16 %v1183_v38, %v352_v30  ;;  %v403_v54 = vsel %vm149_vm4, %v399_v15, %v401_v13 }
  0xb3   :  { %147 = vrot.lane.b32.xlu1 %v141_v49, %s1109_s9  ;;  %v169_v7 = vcombine.low %v167_v6, %v167_v6  ;;  %v534_v11 = vcombine.low %v532_v10, %v532_v10 }
  0xb4   :  { %v363_v40 = vcombine.high %v354_v31, %v354_v31  ;;  %v370_v41 = vrot.slane %v354_v31, %v1164_v24  ;;  %v703_v42 = vrot.slane %v693_v32, %v1164_v24  ;;  %v696_v45 = vcombine.high %v693_v32, %v693_v32 }
  0xb5   :  { %632 = vrot.lane.b32.xlu0 %v627_v53, %s1113_s13  ;;  %v730_v14 = vpop.permute.xlu1 %729 }
  0xb6   :  { %v378_v50 = vcombine.high %v370_v41, %v370_v41  ;;  %v711_v51 = vcombine.high %v703_v42, %v703_v42  ;;  %v377_v52 = vrot.slane %v363_v40, %v1164_v24  ;;  %v735_v2 = vsel %vm149_vm4, %v730_v14, %v732_v17 }
  0xb7   :  { %172 = vrot.lane.b32.xlu1 %v160_v56, %s1113_s13 }
  0xb9   :  { %426 = vrot.lane.b32.xlu0 %v421_v57, %s1113_s13  ;;  %v1284_v16 = vpop.permute.xlu1 %733 }
  0xbb   :  { %509 = vrot.lane.b32.xlu1 %v500_v59, %s1109_s9 }
  0xbd   :  { %759 = vrot.lane.b32.xlu0 %v754_v60, %s1113_s13 }
  0xbf   :  { %513 = vrot.lane.b32.xlu1 %v507_v61, %s1109_s9 }
  0xc1   :  { %145 = vrot.lane.b32.xlu0 %v142_v63, %s1109_s9 }
  0xc3   :  { %537 = vrot.lane.b32.xlu1 %v525_v0, %s1113_s13  ;;  %v438_v0 = vsel %vm179_vm3, %v377_v52, %v401_v13 }
  0xc5   :  { %170 = vrot.lane.b32.xlu0 %v168_v1, %s1113_s13  ;;  %v435_v1 = vsel %vm179_vm3, %v378_v50, %v403_v54 }
  0xc9   :  { %511 = vrot.lane.b32.xlu0 %v508_v3, %s1109_s9 }
  0xcd   :  { %535 = vrot.lane.b32.xlu0 %v533_v5, %s1113_s13 }
  0xd1   :  { %174 = vrot.lane.b32.xlu0 %v169_v7, %s1113_s13 }
  0xd5   :  { %539 = vrot.lane.b32.xlu0 %v534_v11, %s1113_s13 }
 0x111   :  { %v281_v18 = vpop.permute.xlu1 %280 }
 0x113   :  { %v279_v19 = vpop.permute.xlu0 %278 }
 0x114   :  { %v284_v35 = vsel %vm176_vm7, %v279_v19, %v281_v18  ;;  %v765_v19 = vsel %vm179_vm3, %v703_v42, %v735_v2 }
 0x115   :  { %v631_v20 = vpop.permute.xlu1 %630  ;;  %v296_v36 = vsel %vm186_vm8, %v1236_v25, %v284_v35  ;;  %v432_v25 = vsel %vm179_vm3, %v370_v41, %v402_v46  ;;  %v35_v41 = vld [vmem:[#allocation3] sm:$0xf] }
 0x116   :  { %v84_v46 = vmul.bf16 %v1169_v29, %v35_v41 }
 0x117   :  { %v629_v21 = vpop.permute.xlu0 %628 }
 0x118   :  { %v634_v47 = vsel %vm176_vm7, %v629_v21, %v631_v20 }
 0x119   :  { %v425_v27 = vpop.permute.xlu1 %424  ;;  %v646_v57 = vsel %vm186_vm8, %v1247_v37, %v634_v47  ;;  %v736_v37 = vsel %vm149_vm4, %v732_v17, %v1284_v16 }
 0x11b   :  { %v423_v28 = vpop.permute.xlu0 %422 }
 0x11c   :  { %v428_v60 = vsel %vm176_vm7, %v423_v28, %v425_v27 }
 0x11d   :  { %v758_v33 = vpop.permute.xlu1 %757  ;;  %v440_v10 = vsel %vm186_vm8, %v432_v25, %v428_v60 }
 0x11f   :  { %v756_v34 = vpop.permute.xlu0 %755 }
 0x120   :  { %v761_v11 = vsel %vm176_vm7, %v756_v34, %v758_v33 }
 0x121   :  { %v1294_v44 = vpop.permute.xlu1 %143  ;;  %v1353_v32 = vsel %vm186_vm8, %v765_v19, %v761_v11 }
 0x123   :  { %v283_v43 = vpop.permute.xlu0 %282 }
 0x124   :  { %v285_v8 = vsel %vm176_vm7, %v281_v18, %v283_v43 }
 0x125   :  { %v298_v38 = vsel %vm186_vm8, %v1239_v26, %v285_v8  ;;  %v710_v26 = vrot.slane %v696_v45, %v1164_v24  ;;  %v1314_v59 = vpop.permute.xlu1 %147 }
 0x126   :  { %v1017_v48 = vcombine.low %v296_v36, %v298_v38  ;;  %v1019_v49 = vcombine.high %v296_v36, %v298_v38 }
 0x127   :  { %v633_v53 = vpop.permute.xlu0 %632 }
 0x128   :  { %v635_v55 = vsel %vm176_vm7, %v631_v20, %v633_v53  ;;  %v1306_v56 = vrot.slane %v1017_v48, 6  ;;  %v320_v6 = vrot.slane %v1019_v49, 6  ;;  %v771_v20 = vsel %vm179_vm3, %v710_v26, %v1284_v16 }
 0x129   :  { %v648_v58 = vsel %vm186_vm8, %v1250_v39, %v635_v55  ;;  %v173_v23 = vpop.permute.xlu1 %172  ;;  %v650_v36 = vsel %vm186_vm8, %v1233_v22, %v633_v53  ;;  %v124_v49 = vrot.slane %v84_v46, %v1164_v24 }
 0x12a   :  { %v319_v61 = vrot.slane %v1306_v56, 4  ;;  %v1027_v62 = vcombine.low %v646_v57, %v648_v58  ;;  %v1029_v63 = vcombine.high %v646_v57, %v648_v58  ;;  %v1028_v48 = vcombine.low %v650_v36, %v650_v36 }
 0x12b   :  { %v427_v3 = vpop.permute.xlu0 %426  ;;  %v125_v25 = vcombine.high %v124_v49, %v124_v49  ;;  %v1030_v57 = vcombine.high %v650_v36, %v650_v36 }
 0x12c   :  { %v429_v4 = vsel %vm176_vm7, %v425_v27, %v427_v3  ;;  %v444_v5 = vsel %vm186_vm8, %v438_v0, %v427_v3  ;;  %v664_v7 = vrot.slane %v1027_v62, 6  ;;  %v667_v17 = vrot.slane %v1029_v63, 6 }
 0x12d   :  { %v442_v12 = vsel %vm186_vm8, %v435_v1, %v429_v4  ;;  %v1022_v13 = vcombine.low %v444_v5, %v444_v5  ;;  %v1336_v18 = vsel %vm1325_vm10, %v319_v61, %v320_v6  ;;  %v768_v27 = vsel %vm179_vm3, %v711_v51, %v736_v37  ;;  %v510_v45 = vpop.permute.xlu1 %509 }
 0x12e   :  { %v1021_v14 = vcombine.low %v440_v10, %v442_v12  ;;  %v666_v15 = vrot.slane %v664_v7, 4  ;;  %v1024_v42 = vcombine.high %v444_v5, %v444_v5  ;;  %v1023_v38 = vcombine.high %v440_v10, %v442_v12 }
 0x12f   :  { %v760_v21 = vpop.permute.xlu0 %759  ;;  %460 = vrot.lane.b32.xlu0 %v1022_v13, %s1111_s11  ;;  %v665_v53 = vrot.slane %v1028_v48, 6  ;;  %v670_v2 = vrot.slane %v1030_v57, 6 }
 0x130   :  { %v762_v28 = vsel %vm176_vm7, %v758_v33, %v760_v21  ;;  %v1345_v30 = vsel %vm186_vm8, %v771_v20, %v760_v21  ;;  %458 = vrot.lane.b32.xlu1 %v1021_v14, %s1111_s11  ;;  %v1350_v31 = vsel %vm1325_vm10, %v666_v15, %v667_v17  ;;  %v300_v33 = vsel %vm186_vm8, %v1221_v9, %v283_v43  ;;  %v479_v43 = vld [vmem:[#allocation3 + $0x6] sm:$0xf] }
 0x131   :  { %v1356_v16 = vsel %vm186_vm8, %v768_v27, %v762_v28  ;;  %v1032_v34 = vcombine.low %v1345_v30, %v1345_v30  ;;  %v1018_v8 = vcombine.low %v300_v33, %v300_v33  ;;  %v480_v50 = vmul.bf16 %v479_v43, %v1169_v29  ;;  %v514_v52 = vpop.permute.xlu1 %513  ;;  %v822_v27 = vld [vmem:[%s1481_s2] sm:$0xff] }
 0x132   :  { %v1031_v35 = vcombine.low %v1353_v32, %v1356_v16  ;;  %v1020_v22 = vcombine.high %v300_v33, %v300_v33  ;;  %v669_v62 = vrot.slane %v665_v53, 4  ;;  %v1114_v17 = vmov 0  }
 0x133   :  { %793 = vrot.lane.b32.xlu0 %v1032_v34, %s1111_s11  ;;  %v146_v40 = vpop.permute.xlu0 %145  ;;  %v318_v47 = vrot.slane %v1018_v8, 6  ;;  %v490_v26 = vrot.slane %v480_v50, %v1164_v24  ;;  %926 = vmatprep.mubr.bf16.mxu0 %v1114_v17  ;;  %v1033_v20 = vcombine.high %v1353_v32, %v1356_v16 }
 0x134   :  { %791 = vrot.lane.b32.xlu1 %v1031_v35, %s1111_s11  ;;  %v150_v54 = vsel %vm149_vm4, %v1294_v44, %v146_v40  ;;  %v151_v29 = vsel %vm149_vm4, %v146_v40, %v1314_v59  ;;  %v323_v60 = vrot.slane %v1020_v22, 6  ;;  %967 = vmatprep.mubr.bf16.mxu1 %v1114_v17 }
 0x135   :  { %v322_v55 = vrot.slane %v318_v47, 4  ;;  %v538_v63 = vpop.permute.xlu1 %537  ;;  %v185_v0 = vsel %vm179_vm3, %v125_v25, %v151_v29  ;;  %v491_v1 = vcombine.high %v490_v26, %v490_v26  ;;  %1064 = vset.pattern.permute.xlu1 %v1114_v17  ;;  %1065 = vset.pattern.permute.xlu0 %v1114_v17 }
 0x137   :  { %464 = vrot.lane.b32.xlu0 %v1024_v42, %s1111_s11  ;;  %v171_v9 = vpop.permute.xlu0 %170  ;;  %v324_v24 = vsel %vm1325_vm10, %v322_v55, %v323_v60 }
 0x138   :  { %462 = vrot.lane.b32.xlu1 %v1023_v38, %s1111_s11  ;;  %v177_v61 = vsel %vm176_vm7, %v171_v9, %v173_v23 }
 0x13b   :  { %327 = vrot.lane.b32.xlu0 %v318_v47, %s1103_s28  ;;  %v512_v51 = vpop.permute.xlu0 %511 }
 0x13c   :  { %325 = vrot.lane.b32.xlu1 %v1306_v56, %s1103_s28  ;;  %v182_v56 = vsel %vm179_vm3, %v124_v49, %v150_v54  ;;  %v515_v44 = vsel %vm149_vm4, %v510_v45, %v512_v51  ;;  %v516_v3 = vsel %vm149_vm4, %v512_v51, %v514_v52 }
 0x13d   :  { %v1391_v59 = vsel %vm186_vm8, %v182_v56, %v177_v61  ;;  %v545_v4 = vsel %vm179_vm3, %v490_v26, %v515_v44  ;;  %v548_v13 = vsel %vm179_vm3, %v491_v1, %v516_v3 }
 0x13f   :  { %674 = vrot.lane.b32.xlu0 %v665_v53, %s1103_s28  ;;  %v536_v58 = vpop.permute.xlu0 %535 }
 0x140   :  { %672 = vrot.lane.b32.xlu1 %v664_v7, %s1103_s28  ;;  %v541_v6 = vsel %vm176_vm7, %v536_v58, %v538_v63  ;;  %v671_v7 = vsel %vm1325_vm10, %v669_v62, %v670_v2 }
 0x141   :  { %v1411_v15 = vsel %vm186_vm8, %v545_v4, %v541_v6 }
 0x143   :  { %331 = vrot.lane.b32.xlu0 %v324_v24, %s1103_s28  ;;  %v175_v37 = vpop.permute.xlu0 %174 }
 0x144   :  { %329 = vrot.lane.b32.xlu1 %v1336_v18, %s1103_s28  ;;  %v178_v5 = vsel %vm176_vm7, %v173_v23, %v175_v37  ;;  %v1034_v18 = vcombine.high %v1345_v30, %v1345_v30 }
 0x145   :  { %v1402_v10 = vsel %vm186_vm8, %v185_v0, %v178_v5 }
 0x146   :  { %v1015_v11 = vcombine.low %v1391_v59, %v1402_v10  ;;  %v1016_v12 = vcombine.high %v1391_v59, %v1402_v10 }
 0x147   :  { %678 = vrot.lane.b32.xlu0 %v671_v7, %s1103_s28  ;;  %v540_v14 = vpop.permute.xlu0 %539 }
 0x148   :  { %676 = vrot.lane.b32.xlu1 %v1350_v31, %s1103_s28  ;;  %202 = vst [vmem:[#allocation2 + $0x10] sm:$0x33] %v1016_v12  ;;  %v542_v39 = vsel %vm176_vm7, %v538_v63, %v540_v14 }
 0x149   :  { %v1419_v19 = vsel %vm186_vm8, %v548_v13, %v542_v39 }
 0x14a   :  { %v1025_v21 = vcombine.low %v1411_v15, %v1419_v19  ;;  %v1026_v23 = vcombine.high %v1411_v15, %v1419_v19 }
 0x14b   :  { %797 = vrot.lane.b32.xlu0 %v1034_v18, %s1111_s11 }
 0x14c   :  { %795 = vrot.lane.b32.xlu1 %v1033_v20, %s1111_s11  ;;  %564 = vst [vmem:[#allocation2 + $0x18] sm:$0x33] %v1026_v23 }
 0x150   :  { %825 = vperm.xlu1 %1064, %v822_v27  }
 0x1a1   :  { %v461_v28 = vpop.permute.xlu0 %460 }
 0x1a2   :  { %v467_v30 = vrot.slane %v461_v28, 4  ;;  %v459_v31 = vpop.permute.xlu1 %458 }
 0x1a3   :  { %v466_v32 = vrot.slane %v459_v31, 4 }
 0x1a5   :  { %v470_v16 = vsel %vm186_vm8, %v466_v32, %v467_v30  ;;  %v794_v34 = vpop.permute.xlu0 %793 }
 0x1a6   :  { %v1434_v33 = vsel %vm351_vm6, %v459_v31, %v470_v16  ;;  %v800_v35 = vrot.slane %v794_v34, 4  ;;  %v792_v40 = vpop.permute.xlu1 %791 }
 0x1a7   :  { %v799_v41 = vrot.slane %v792_v40, 4 }
 0x1a9   :  { %v803_v42 = vsel %vm186_vm8, %v799_v41, %v800_v35  ;;  %v465_v8 = vpop.permute.xlu0 %464 }
 0x1aa   :  { %v1438_v45 = vsel %vm351_vm6, %v792_v40, %v803_v42  ;;  %v469_v36 = vrot.slane %v465_v8, 4  ;;  %v463_v38 = vpop.permute.xlu1 %462 }
 0x1ab   :  { %v468_v46 = vrot.slane %v463_v38, 4 }
 0x1ad   :  { %v472_v9 = vsel %vm186_vm8, %v468_v46, %v469_v36  ;;  %v328_v43 = vpop.permute.xlu0 %327 }
 0x1ae   :  { %v473_v47 = vsel %vm351_vm6, %v463_v38, %v472_v9  ;;  %v334_v48 = vrot.slane %v328_v43, 4  ;;  %v326_v49 = vpop.permute.xlu1 %325 }
 0x1af   :  { %477 = vst [vmem:[#allocation2 + $0x40] sm:$0x33] %v473_v47  ;;  %v333_v50 = vrot.slane %v326_v49, 4 }
 0x1b1   :  { %v338_v51 = vsel %vm186_vm8, %v333_v50, %v334_v48  ;;  %v675_v52 = vpop.permute.xlu0 %674 }
 0x1b2   :  { %v340_v22 = vsel %vm339_vm11, %v326_v49, %v338_v51  ;;  %v681_v53 = vrot.slane %v675_v52, 4  ;;  %v673_v54 = vpop.permute.xlu1 %672 }
 0x1b3   :  { %345 = vst [vmem:[#allocation2 + $0x10] sm:$0xcc] %v340_v22  ;;  %v680_v55 = vrot.slane %v673_v54, 4 }
 0x1b5   :  { %v684_v25 = vsel %vm186_vm8, %v680_v55, %v681_v53  ;;  %v332_v26 = vpop.permute.xlu0 %331 }
 0x1b6   :  { %v685_v57 = vsel %vm339_vm11, %v673_v54, %v684_v25  ;;  %v336_v29 = vrot.slane %v332_v26, 4  ;;  %v330_v58 = vpop.permute.xlu1 %329  ;;  %v820_v13 = vld [vmem:[#allocation2 + $0x40] sm:$0x33] }
 0x1b7   :  { %690 = vst [vmem:[#allocation2 + $0x18] sm:$0xcc] %v685_v57  ;;  %v335_v60 = vrot.slane %v330_v58, 4  ;;  %v1044_v39 = vcombine.high %v820_v13, %v820_v13  ;;  %v1043_v20 = vcombine.low %v820_v13, %v820_v13 }
 0x1b9   :  { %v341_v56 = vsel %vm186_vm8, %v335_v60, %v336_v29  ;;  %v679_v61 = vpop.permute.xlu0 %678  ;;  %v883_v19 = vsel %vm179_vm3, %v1043_v20, 0 }
 0x1ba   :  { %v342_v62 = vsel %vm339_vm11, %v330_v58, %v341_v56  ;;  %v683_v44 = vrot.slane %v679_v61, 4  ;;  %v677_v63 = vpop.permute.xlu1 %676  ;;  %v814_v24 = vld [vmem:[#allocation2 + $0x10] sm:$0xff] }
 0x1bb   :  { %v682_v0 = vrot.slane %v677_v63, 4  ;;  %v1036_v1 = vcombine.high %v1015_v11, %v814_v24  ;;  %v1076_v2 = vcombine.low %v1391_v59, %v814_v24  ;;  %v1040_v4 = vcombine.high %v342_v62, %v1434_v33 }
 0x1bc   :  { %v1039_v11 = vcombine.low %v342_v62, %v1434_v33 }
 0x1bd   :  { %v686_v37 = vsel %vm186_vm8, %v682_v0, %v683_v44  ;;  %v798_v3 = vpop.permute.xlu0 %797  ;;  %894 = vmatprep.subr.bf16.mxu0 %v1036_v1 }
 0x1be   :  { %v687_v5 = vsel %vm339_vm11, %v677_v63, %v686_v37  ;;  %v802_v6 = vrot.slane %v798_v3, 4  ;;  %v796_v7 = vpop.permute.xlu1 %795  ;;  %895 = vmatpush1.bf16.msra.mxu0 %v1076_v2  ;;  %v815_v12 = vld [vmem:[#allocation2 + $0x18] sm:$0xff] }
 0x1bf   :  { %v801_v14 = vrot.slane %v796_v7, 4  ;;  %v1038_v10 = vcombine.high %v1025_v21, %v815_v12  ;;  %v1077_v59 = vcombine.low %v1411_v15, %v815_v12  ;;  %896 = vmatprep.subr.bf16.mxu0 %v1040_v4  ;;  %v1042_v18 = vcombine.high %v687_v5, %v1438_v45  ;;  %v811_v21 = vld [vmem:[%s1480_s1] sm:$0xf] }
 0x1c0   :  { %v1041_v15 = vcombine.low %v687_v5, %v1438_v45 }
 0x1c1   :  { %v805_v17 = vsel %vm186_vm8, %v801_v14, %v802_v6  ;;  %935 = vmatprep.subr.bf16.mxu1 %v1038_v10 }
 0x1c2   :  { %v806_v23 = vsel %vm351_vm6, %v796_v7, %v805_v17  ;;  %936 = vmatpush1.bf16.msra.mxu1 %v1077_v59  ;;  %897 = vmatpush1.bf16.msra.mxu0 %v1039_v11 }
 0x1c3   :  { %810 = vst [vmem:[#allocation2 + $0x48] sm:$0x33] %v806_v23  ;;  %1047 = vmatprep.subr.msk.bf16.mxu0 %vm179_vm3, %v1044_v39  ;;  %937 = vmatprep.subr.bf16.mxu1 %v1042_v18 }
 0x1c6   :  { %899 = vmatpush1.bf16.msra.mxu0 %v883_v19  ;;  %938 = vmatpush1.bf16.msra.mxu1 %v1041_v15 }
 0x1c9   :  { %1048 = vmatmul.mubr.msk.bf16.vlgmr.msra.gmra.mrb[0].mxu0 %vm214_vm1, %v811_v21 }
 0x1ca   :  { %v821_v27 = vld [vmem:[#allocation2 + $0x48] sm:$0x33] }
 0x1cb   :  { %v1046_v28 = vcombine.high %v821_v27, %v821_v27  ;;  %v1045_v30 = vcombine.low %v821_v27, %v821_v27 }
 0x1cd   :  { %1049 = vmatprep.subr.msk.bf16.mxu1 %vm179_vm3, %v1046_v28  ;;  %v889_v31 = vsel %vm179_vm3, %v1045_v30, 0 }
 0x1ce   :  { %940 = vmatpush1.bf16.msra.mxu1 %v889_v31 }
 0x1cf   :  { %v826_v32 = vpop.permute.xlu1 %825 }
 0x1d1   :  { %1050 = vmatmul.mubr.msk.bf16.vlgmr.msra.gmra.mrb[0].mxu1 %vm214_vm1, %v811_v21 }
 0x29c   :  { %v928_v16 = vpop.f32.mrb[0].mxu0 }
 0x29d   :  { %v929_v34 = vadd.f32 %v928_v16, %v826_v32  ;;  %v930_v33 = vpop.f32.mrb[1].mxu0 }
 0x29e   :  { %v931_v35 = vadd.f32 %v930_v33, %v826_v32  ;;  %v932_v40 = vpop.f32.mrb[2].mxu0 }
 0x29f   :  { %vm976_vm12 = vcmp.gt.f32.partialorder %v929_v34, 0.0  ;;  %v980_v41 = vmul.f32 0.01, %v929_v34  ;;  %v933_v42 = vpop.f32.mrb[3].mxu0 }
 0x2a0   :  { %vm977_vm13 = vcmp.gt.f32.partialorder %v931_v35, 0.0  ;;  %v981_v8 = vmul.f32 0.01, %v931_v35 }
 0x2a1   :  { %v984_v45 = vsel %vm976_vm12, %v929_v34, %v980_v41 }
 0x2a2   :  { %v995_v36 = vmul.f32 %v984_v45, %v984_v45  ;;  %v985_v38 = vsel %vm977_vm13, %v931_v35, %v981_v8 }
 0x2a3   :  { %v996_v46 = vmul.f32 %v985_v38, %v985_v38  ;;  %v988_v9 = vadd.f32 %v985_v38, %v984_v45 }
 0x2a4   :  { %v969_v43 = vpop.f32.mrb[0].mxu1 }
 0x2a5   :  { %v970_v47 = vadd.f32 %v969_v43, %v826_v32  ;;  %v971_v48 = vpop.f32.mrb[1].mxu1  ;;  %v999_v49 = vadd.f32 %v996_v46, %v995_v36 }
 0x2a6   :  { %v972_v50 = vadd.f32 %v971_v48, %v826_v32  ;;  %v973_v51 = vpop.f32.mrb[2].mxu1 }
 0x2a7   :  { %vm978_vm14 = vcmp.gt.f32.partialorder %v970_v47, 0.0  ;;  %v982_v52 = vmul.f32 0.01, %v970_v47  ;;  %v974_v22 = vpop.f32.mrb[3].mxu1 }
 0x2a8   :  { %v983_v53 = vmul.f32 0.01, %v972_v50  ;;  %vm979_vm15 = vcmp.gt.f32.partialorder %v972_v50, 0.0 }
 0x2a9   :  { %v986_v54 = vsel %vm978_vm14, %v970_v47, %v982_v52 }
 0x2aa   :  { %v987_v55 = vsel %vm979_vm15, %v972_v50, %v983_v53  ;;  %v989_v25 = vadd.f32 %v988_v9, %v986_v54  ;;  %v997_v26 = vmul.f32 %v986_v54, %v986_v54 }
 0x2ab   :  { %v998_v57 = vmul.f32 %v987_v55, %v987_v55 }
 0x2ac   :  { %v990_v29 = vadd.f32 %v989_v25, %v987_v55  ;;  %v1000_v58 = vadd.f32 %v999_v49, %v997_v26 }
 0x2ae   :  { %991 = vadd.xlane.f32.xlu0 %v990_v29  ;;  %v1001_v60 = vadd.f32 %v1000_v58, %v998_v57 }
 0x2b0   :  { %1002 = vadd.xlane.f32.xlu1 %v1001_v60 }
 0x33b   :  { %v992_v56 = vpop.xlane.xlu0 %991 }
 0x33c   :  { %994 = vst.msk [vmem:[%s1483_s4] sm:$0xff] %vm993_vm0, %v992_v56 }
 0x33d   :  { %v1003_v61 = vpop.xlane.xlu1 %1002 }
 0x33e   :  { %1004 = vst.msk [vmem:[%s1484_s5] sm:$0xff] %vm993_vm0, %v1003_v61 }
 0x33f   :  { %1013 = vsyncpa [#allocation4], 1 }

</bundles_post_ra>
